<compile_context>
chip_gen: v7x
topology: tpu7x:2x2x1
jax: 0.10.0
libtpu: 0.0.40
codegen_flags: <defaults>
</compile_context>

<pallas_src>
import jax
import jax.numpy as jnp
from jax import lax
from jax.experimental import pallas as pl
from jax.experimental.pallas import tpu as pltpu


def _round_up(x: int, m: int) -> int:
    return ((x + m - 1) // m) * m


def _wsum_max_kernel(glo_ref, ghi_ref,                  # scalar-prefetch (SMEM)
                     feats_ref, segrow_ref, segcol_ref, w_ref, b_ref,
                     hsum_ref, hmax_ref):
    i = pl.program_id(0)                 # graph-block index ("parallel")
    j = pl.program_id(1)                 # node-tile index   ("arbitrary" reduction)
    tb = hsum_ref.shape[0]
    tn = feats_ref.shape[0]

    # Init the resident output accumulators on the first node tile of this block.
    @pl.when(j == 0)
    def _init():
        hsum_ref[...] = jnp.zeros_like(hsum_ref)
        hmax_ref[...] = jnp.full(hmax_ref.shape, -jnp.inf, dtype=hmax_ref.dtype)

    feats = feats_ref[...]               # (tn, M1p) f32
    b = b_ref[0]                         # scalar bias from SMEM

    # Per-node gate on the (otherwise idle) MXU; sigmoid rides the EUP slot.
    logits = jnp.dot(feats, w_ref[...], preferred_element_type=jnp.float32) + b
    atom_w = jax.nn.sigmoid(logits)                              # (tn, 1)
    weighted = feats * atom_w                                    # (tn, M1p) f32

    # --- segment-sum: one-hot membership built in-kernel, MXU matmul ------------
    seg_row = segrow_ref[...]                                    # (1, tn) i32, pad = -1
    row_ids = lax.broadcasted_iota(jnp.int32, (tb, tn), 0) + i * tb
    member = (row_ids == seg_row).astype(jnp.float32)            # (tb, tn), exact 0/1
    hsum_ref[...] += jnp.dot(member, weighted,
                             preferred_element_type=jnp.float32)

    # --- segment-max: only graphs actually present in this node tile ------------
    # Contiguous (sorted) segment ids => graphs in this tile are [g_lo, g_hi].
    seg_col = segcol_ref[...]                                    # (tn, 1) i32, pad = -1
    g_first = jnp.maximum(glo_ref[j], i * tb)
    g_last = jnp.minimum(ghi_ref[j], i * tb + tb - 1)
    neg_inf = jnp.float32(-jnp.inf)

    def body(g, carry):
        masked = jnp.where(seg_col == g, feats, neg_inf)         # (tn, M1p)
        tile_max = jnp.max(masked, axis=0, keepdims=True)        # (1, M1p)
        r = g - i * tb                                           # local output row
        hmax_ref[pl.ds(r, 1), :] = jnp.maximum(hmax_ref[pl.ds(r, 1), :], tile_max)
        return carry

    lax.fori_loop(g_first, g_last + 1, body, 0)


def weighted_sum_and_max(feats, segment_ids, num_graphs, weight, bias,
                         *, tn: int = 1024, num_graph_blocks: int = 1):
    """feats: (N, M1) f32, segment_ids: (N,) int32 sorted (DGL contiguous batching),
    weight: (1, M1) f32, bias: (1,) f32  ->  (num_graphs, 2*M1) f32.

    num_graph_blocks > 1 splits the graph axis ("parallel") for v7x megacore at the
    cost of re-reading feats once per extra block."""
    N, M1 = feats.shape
    f32 = jnp.float32

    # Contiguity requirement for the per-tile [g_lo, g_hi] trick (true for DGL batching).
    try:
        is_sorted = bool(jnp.all(segment_ids[1:] >= segment_ids[:-1]))
    except jax.errors.ConcretizationTypeError:
        is_sorted = True   # TODO(synk): cannot verify sortedness under tracing.
    if not is_sorted:
        raise ValueError("segment_ids must be sorted (contiguous DGL batching)")

    M1p = _round_up(M1, 128)                          # lane-dense feature dim
    tn = max(128, min(_round_up(tn, 128), _round_up(N, 128)))
    Np = _round_up(N, tn)
    n_tiles = Np // tn
    tb = _round_up(-(-num_graphs // num_graph_blocks), 8)
    Bp = tb * num_graph_blocks

    seg32 = segment_ids.astype(jnp.int32)
    feats_p = jnp.zeros((Np, M1p), f32).at[:N, :M1].set(feats.astype(f32))
    seg_row = jnp.full((1, Np), -1, jnp.int32).at[0, :N].set(seg32)     # lane-major
    seg_col = jnp.full((Np, 1), -1, jnp.int32).at[:N, 0].set(seg32)     # sublane-major
    w_col = jnp.zeros((M1p, 1), f32).at[:M1, 0].set(weight.reshape(-1).astype(f32))
    bias = bias.astype(f32).reshape((1,))

    # Per-node-tile graph ranges (scalar prefetch -> SMEM).
    starts = jnp.arange(n_tiles, dtype=jnp.int32) * tn
    ends = jnp.minimum(starts + tn, N) - 1
    g_lo = seg32[starts]
    g_hi = seg32[ends]

    grid = (num_graph_blocks, n_tiles)
    h_sum, h_max = pl.pallas_call(
        _wsum_max_kernel,
        out_shape=(jax.ShapeDtypeStruct((Bp, M1p), f32),
                   jax.ShapeDtypeStruct((Bp, M1p), f32)),
        grid_spec=pltpu.PrefetchScalarGridSpec(
            num_scalar_prefetch=2,
            grid=grid,
            in_specs=[
                pl.BlockSpec((tn, M1p), lambda i, j, glo, ghi: (j, 0)),   # feats tile
                pl.BlockSpec((1, tn), lambda i, j, glo, ghi: (0, j)),     # seg ids (lane)
                pl.BlockSpec((tn, 1), lambda i, j, glo, ghi: (j, 0)),     # seg ids (sublane)
                pl.BlockSpec((M1p, 1), lambda i, j, glo, ghi: (0, 0)),    # Linear weight
                pl.BlockSpec(memory_space=pltpu.MemorySpace.SMEM),        # bias scalar
            ],
            out_specs=[
                pl.BlockSpec((tb, M1p), lambda i, j, glo, ghi: (i, 0)),   # h_sum (resident over j)
                pl.BlockSpec((tb, M1p), lambda i, j, glo, ghi: (i, 0)),   # h_max (resident over j)
            ],
        ),
        compiler_params=pltpu.CompilerParams(
            dimension_semantics=("parallel", "arbitrary"),
        ),
    )(g_lo, g_hi, feats_p, seg_row, seg_col, w_col, bias)

    h_sum = h_sum[:num_graphs, :M1]
    h_max = h_max[:num_graphs, :M1]
    # dgl.max_nodes returns 0 for empty graphs; untouched (-inf) rows map to 0.
    h_max = jnp.where(jnp.isneginf(h_max), jnp.float32(0), h_max)
    return jnp.concatenate([h_sum, h_max], axis=1)


def _reference(feats, segment_ids, num_graphs, weight, bias):
    atom_w = jax.nn.sigmoid(feats @ weight[0] + bias[0])[:, None]
    weighted = feats * atom_w
    member = jax.nn.one_hot(segment_ids, num_graphs, dtype=jnp.float32).T
    h_sum = member @ weighted
    masked = jnp.where(member[:, :, None] > 0, feats[None, :, :], -jnp.inf)
    h_max = jnp.max(masked, axis=1)
    return jnp.concatenate([h_sum, h_max], axis=1)


if __name__ == "__main__":
    key = jax.random.PRNGKey(0)
    k1, k2, k3 = jax.random.split(key, 3)

    B = 2          # number of graphs in the batch
    N = 8          # total number of nodes across the batch
    M1 = 32        # in_feats

    feats = jax.random.normal(k1, (N, M1), dtype=jnp.float32)
    # Graph 0 has 3 nodes, graph 1 has 5 nodes (contiguous DGL-style batching).
    segment_ids = jnp.array([0, 0, 0, 1, 1, 1, 1, 1], dtype=jnp.int32)

    # Deterministic params of nn.Linear(in_feats, 1) inside WeightAndSum.
    weight = jax.random.normal(k2, (1, M1), dtype=jnp.float32) / jnp.sqrt(M1)
    bias = jax.random.normal(k3, (1,), dtype=jnp.float32) * 0.1

    out = weighted_sum_and_max(feats, segment_ids, B, weight, bias)
    out = jax.block_until_ready(out)

    ref = _reference(feats, segment_ids, B, weight, bias)
    assert out.shape == (B, 2 * M1)
    assert jnp.allclose(out, ref, atol=1e-5, rtol=1e-5), "mismatch vs reference"

    print("KERNEL_OK")
</pallas_src>

<mosaic_0001>
module attributes {stable_mosaic.version = 11 : i64} {
  func.func @_wsum_max_kernel(%arg0: i32, %arg1: i32, %arg2: memref<1xi32, #tpu.memory_space<smem>>, %arg3: memref<1xi32, #tpu.memory_space<smem>>, %arg4: memref<128x128xf32, #tpu.memory_space<vmem>>, %arg5: memref<1x128xi32, #tpu.memory_space<vmem>>, %arg6: memref<128x1xi32, #tpu.memory_space<vmem>>, %arg7: memref<128x1xf32, #tpu.memory_space<vmem>>, %arg8: memref<1xf32, #tpu.memory_space<smem>>, %arg9: memref<8x128xf32, #tpu.memory_space<vmem>>, %arg10: memref<8x128xf32, #tpu.memory_space<vmem>>) attributes {dimension_semantics = [#tpu.dimension_semantics<parallel>, #tpu.dimension_semantics<arbitrary>], iteration_bounds = array<i64: 1, 1>, scalar_prefetch = 2 : i64, scratch_operands = 0 : i64, tpu.core_type = #tpu.core_type<tc>, window_params = [{transform_indices = @transform_0, window_bounds = array<i64: 128, 128>}, {transform_indices = @transform_1, window_bounds = array<i64: 1, 128>}, {transform_indices = @transform_2, window_bounds = array<i64: 128, 1>}, {pipeline_mode = #tpu.pipeline_mode<synchronous>, transform_indices = @transform_3, window_bounds = array<i64: 128, 1>}, {transform_indices = @transform_4, window_bounds = array<i64: 1>}, {transform_indices = @transform_5, window_bounds = array<i64: 8, 128>}, {transform_indices = @transform_6, window_bounds = array<i64: 8, 128>}]} {
    %c0_i32 = arith.constant 0 : i32
    %0 = arith.cmpi eq, %arg1, %c0_i32 : i32
    %1 = arith.extui %0 : i1 to i32
    %c0_i32_0 = arith.constant 0 : i32
    %2 = arith.cmpi ne, %1, %c0_i32_0 : i32
    scf.if %2 {
      %cst_22 = arith.constant 0.000000e+00 : f32
      %43 = vector.broadcast %cst_22 : f32 to vector<8x128xf32>
      %c0_23 = arith.constant 0 : index
      %c0_24 = arith.constant 0 : index
      %44 = vector.load %arg9[%c0_23, %c0_24] : memref<8x128xf32, #tpu.memory_space<vmem>>, vector<8x128xf32>
      tpu.vector_store %arg9[%c0_23, %c0_24], %43 {strides = array<i32>} : memref<8x128xf32, #tpu.memory_space<vmem>>, vector<8x128xf32>,
      %cst_25 = arith.constant 0xFF800000 : f32
      %45 = vector.broadcast %cst_25 : f32 to vector<8x128xf32>
      %c0_26 = arith.constant 0 : index
      %c0_27 = arith.constant 0 : index
      %46 = vector.load %arg10[%c0_26, %c0_27] : memref<8x128xf32, #tpu.memory_space<vmem>>, vector<8x128xf32>
      tpu.vector_store %arg10[%c0_26, %c0_27], %45 {strides = array<i32>} : memref<8x128xf32, #tpu.memory_space<vmem>>, vector<8x128xf32>,
    } else {
    }
    %c0 = arith.constant 0 : index
    %c0_1 = arith.constant 0 : index
    %3 = vector.load %arg4[%c0, %c0_1] : memref<128x128xf32, #tpu.memory_space<vmem>>, vector<128x128xf32>
    %c0_2 = arith.constant 0 : index
    %4 = memref.load %arg8[%c0_2] : memref<1xf32, #tpu.memory_space<smem>>
    %c0_3 = arith.constant 0 : index
    %c0_4 = arith.constant 0 : index
    %5 = vector.load %arg7[%c0_3, %c0_4] : memref<128x1xf32, #tpu.memory_space<vmem>>, vector<128x1xf32>
    %cst = arith.constant dense<0.000000e+00> : vector<128x1xf32>
    %6 = tpu.matmul %3, %5, %cst {dimension_numbers = #tpu.dot_dimension_numbers<[1], [0], [0], [1], [0, 0, 1, 1], [], []>} : vector<128x128xf32>, vector<128x1xf32>, vector<128x1xf32> -> vector<128x1xf32>
    %7 = vector.broadcast %4 : f32 to vector<128x1xf32>
    %8 = arith.addf %6, %7 : vector<128x1xf32>
    %9 = arith.negf %8 : vector<128x1xf32>
    %10 = math.exp %9 : vector<128x1xf32>
    %cst_5 = arith.constant 1.000000e+00 : f32
    %11 = vector.broadcast %cst_5 : f32 to vector<128x1xf32>
    %12 = arith.addf %11, %10 : vector<128x1xf32>
    %13 = arith.divf %11, %12 : vector<128x1xf32>
    %14 = vector.broadcast %13 : vector<128x1xf32> to vector<128x128xf32>
    %15 = arith.mulf %3, %14 : vector<128x128xf32>
    %c0_6 = arith.constant 0 : index
    %c0_7 = arith.constant 0 : index
    %16 = vector.load %arg5[%c0_6, %c0_7] : memref<1x128xi32, #tpu.memory_space<vmem>>, vector<1x128xi32>
    %17 = tpu.iota {dimensions = array<i32: 0>} : vector<8x128xi32>
    %c8_i32 = arith.constant 8 : i32
    %18 = arith.muli %arg0, %c8_i32 : i32
    %19 = vector.broadcast %18 : i32 to vector<8x128xi32>
    %20 = arith.addi %17, %19 : vector<8x128xi32>
    %21 = vector.broadcast %16 : vector<1x128xi32> to vector<8x128xi32>
    %22 = arith.cmpi eq, %20, %21 : vector<8x128xi32>
    %23 = arith.extui %22 : vector<8x128xi1> to vector<8x128xi32>
    %24 = arith.sitofp %23 : vector<8x128xi32> to vector<8x128xf32>
    %c0_8 = arith.constant 0 : index
    %c0_9 = arith.constant 0 : index
    %25 = vector.load %arg9[%c0_8, %c0_9] : memref<8x128xf32, #tpu.memory_space<vmem>>, vector<8x128xf32>
    %cst_10 = arith.constant dense<0.000000e+00> : vector<8x128xf32>
    %26 = tpu.matmul %24, %15, %cst_10 {dimension_numbers = #tpu.dot_dimension_numbers<[1], [0], [0], [1], [0, 0, 1, 1], [], []>} : vector<8x128xf32>, vector<128x128xf32>, vector<8x128xf32> -> vector<8x128xf32>
    %27 = arith.addf %25, %26 : vector<8x128xf32>
    %c0_11 = arith.constant 0 : index
    %c0_12 = arith.constant 0 : index
    %28 = vector.load %arg9[%c0_11, %c0_12] : memref<8x128xf32, #tpu.memory_space<vmem>>, vector<8x128xf32>
    tpu.vector_store %arg9[%c0_11, %c0_12], %27 {strides = array<i32>} : memref<8x128xf32, #tpu.memory_space<vmem>>, vector<8x128xf32>,
    %c0_13 = arith.constant 0 : index
    %c0_14 = arith.constant 0 : index
    %29 = vector.load %arg6[%c0_13, %c0_14] : memref<128x1xi32, #tpu.memory_space<vmem>>, vector<128x1xi32>
    %30 = arith.index_cast %arg1 : i32 to index
    %31 = memref.load %arg2[%30] : memref<1xi32, #tpu.memory_space<smem>>
    %c8_i32_15 = arith.constant 8 : i32
    %32 = arith.muli %arg0, %c8_i32_15 : i32
    %33 = arith.maxsi %31, %32 : i32
    %34 = arith.index_cast %arg1 : i32 to index
    %35 = memref.load %arg3[%34] : memref<1xi32, #tpu.memory_space<smem>>
    %c8_i32_16 = arith.constant 8 : i32
    %36 = arith.muli %arg0, %c8_i32_16 : i32
    %c8_i32_17 = arith.constant 8 : i32
    %37 = arith.addi %36, %c8_i32_17 : i32
    %c1_i32 = arith.constant 1 : i32
    %38 = arith.subi %37, %c1_i32 : i32
    %39 = arith.minsi %35, %38 : i32
    %c1_i32_18 = arith.constant 1 : i32
    %40 = arith.addi %39, %c1_i32_18 : i32
    %c0_i32_19 = arith.constant 0 : i32
    %cst_20 = arith.constant 0xFF800000 : f32
    %41 = arith.subi %40, %33 : i32
    %42 = arith.addi %33, %41 : i32
    %c1_i32_21 = arith.constant 1 : i32
    scf.for %arg11 = %33 to %42 step %c1_i32_21  : i32 {
      %43 = vector.broadcast %arg11 : i32 to vector<128x1xi32>
      %44 = arith.cmpi eq, %29, %43 : vector<128x1xi32>
      %45 = vector.shape_cast %44 : vector<128x1xi1> to vector<128x1xi1>
      %46 = vector.broadcast %45 : vector<128x1xi1> to vector<128x128xi1>
      %47 = vector.broadcast %cst_20 : f32 to vector<128x128xf32>
      %48 = arith.select %46, %3, %47 : vector<128x128xi1>, vector<128x128xf32>
      %cst_22 = arith.constant dense<0xFF800000> : vector<128xf32>
      %49 = vector.multi_reduction <maximumf>, %48, %cst_22 [0] : vector<128x128xf32> to vector<128xf32>
      %50 = vector.shape_cast %49 : vector<128xf32> to vector<1x128xf32>
      %c8_i32_23 = arith.constant 8 : i32
      %51 = arith.muli %arg0, %c8_i32_23 : i32
      %52 = arith.subi %arg11, %51 : i32
      %53 = arith.index_cast %52 : i32 to index
      %c0_24 = arith.constant 0 : index
      %54 = vector.load %arg10[%53, %c0_24] : memref<8x128xf32, #tpu.memory_space<vmem>>, vector<1x128xf32>
      %55 = arith.maximumf %54, %50 : vector<1x128xf32>
      %56 = arith.index_cast %52 : i32 to index
      %c0_25 = arith.constant 0 : index
      %57 = vector.load %arg10[%56, %c0_25] : memref<8x128xf32, #tpu.memory_space<vmem>>, vector<1x128xf32>
      tpu.vector_store %arg10[%56, %c0_25], %55 {strides = array<i32>} : memref<8x128xf32, #tpu.memory_space<vmem>>, vector<1x128xf32>,
    }
    return
  }
  func.func @transform_0(%arg0: i32, %arg1: i32, %arg2: memref<1xi32, #tpu.memory_space<smem>>, %arg3: memref<1xi32, #tpu.memory_space<smem>>) -> (i32, i32) {
    %c0_i32 = arith.constant 0 : i32
    %c0_i32_0 = arith.constant 0 : i32
    return %arg1, %c0_i32 : i32, i32
  }
  func.func @transform_1(%arg0: i32, %arg1: i32, %arg2: memref<1xi32, #tpu.memory_space<smem>>, %arg3: memref<1xi32, #tpu.memory_space<smem>>) -> (i32, i32) {
    %c0_i32 = arith.constant 0 : i32
    %c0_i32_0 = arith.constant 0 : i32
    return %c0_i32, %arg1 : i32, i32
  }
  func.func @transform_2(%arg0: i32, %arg1: i32, %arg2: memref<1xi32, #tpu.memory_space<smem>>, %arg3: memref<1xi32, #tpu.memory_space<smem>>) -> (i32, i32) {
    %c0_i32 = arith.constant 0 : i32
    %c0_i32_0 = arith.constant 0 : i32
    return %arg1, %c0_i32 : i32, i32
  }
  func.func @transform_3(%arg0: i32, %arg1: i32, %arg2: memref<1xi32, #tpu.memory_space<smem>>, %arg3: memref<1xi32, #tpu.memory_space<smem>>) -> (i32, i32) {
    %c0_i32 = arith.constant 0 : i32
    %c0_i32_0 = arith.constant 0 : i32
    %c0_i32_1 = arith.constant 0 : i32
    return %c0_i32, %c0_i32_0 : i32, i32
  }
  func.func @transform_4(%arg0: i32, %arg1: i32, %arg2: memref<1xi32, #tpu.memory_space<smem>>, %arg3: memref<1xi32, #tpu.memory_space<smem>>) -> i32 {
    %c0_i32 = arith.constant 0 : i32
    %c0_i32_0 = arith.constant 0 : i32
    return %c0_i32 : i32
  }
  func.func @transform_5(%arg0: i32, %arg1: i32, %arg2: memref<1xi32, #tpu.memory_space<smem>>, %arg3: memref<1xi32, #tpu.memory_space<smem>>) -> (i32, i32) {
    %c0_i32 = arith.constant 0 : i32
    %c0_i32_0 = arith.constant 0 : i32
    return %arg0, %c0_i32 : i32, i32
  }
  func.func @transform_6(%arg0: i32, %arg1: i32, %arg2: memref<1xi32, #tpu.memory_space<smem>>, %arg3: memref<1xi32, #tpu.memory_space<smem>>) -> (i32, i32) {
    %c0_i32 = arith.constant 0 : i32
    %c0_i32_0 = arith.constant 0 : i32
    return %arg0, %c0_i32 : i32, i32
  }
}

</mosaic_0001>

<bundles_post_ra>
// kernel: tpu_custom_call.1
= control target key start
LH: loop header
LB: loop body
LE: loop exit
PB: predicated region body
PF: predicated region fallthrough
CT: control target
= control target key end

     0   :  { %17 = vsyncpa [#allocation7], 0  ;;  %s1462_s0 = inlined_call_operand.<no memory space> [shape: s32[1], index: 0, kind: input, shape index: {}]   ;;  %s1463_s1 = inlined_call_operand.<no memory space> [shape: s32[1], index: 1, kind: input, shape index: {}]   ;;  %s1464_s2 = inlined_call_operand.vmem [shape: f32[128,128], index: 2, kind: input, shape index: {}]   ;;  %s1465_s3 = inlined_call_operand.vmem [shape: s32[1,128], index: 3, kind: input, shape index: {}]   ;;  %s1466_s4 = inlined_call_operand.vmem [shape: s32[128,1], index: 4, kind: input, shape index: {}]   ;;  %s1467_s5 = inlined_call_operand.vmem [shape: f32[128,1], index: 5, kind: input, shape index: {}]   ;;  %s1468_s6 = inlined_call_operand.<no memory space> [shape: f32[1], index: 6, kind: input, shape index: {}]   ;;  %s1469_s7 = inlined_call_operand.hbm [shape: f32[8,128], index: 7, kind: output, shape index: {0}]   ;;  %s1470_s8 = inlined_call_operand.hbm [shape: f32[8,128], index: 8, kind: output, shape index: {1}]  }
   0x1   :  { %18 = vsyncpa [#allocation9], 0  ;;  %v52_v0 = vld [vmem:[%s1467_s5] sm:$0xff]  ;;  %v53_v1 = vld [vmem:[%s1467_s5 + $0x8] sm:$0xff]  ;;  %v1051_v2 = vmov -inf   ;;  %v1052_v41 = vmov 0   ;;  %v1252_v42 = vstv %s1468_s6 }
   0x2   :  { %34 = vst [vmem:[#allocation8] sm:$0xff] %v1051_v2  ;;  %v854_v3 = vpack.c.bf16 %v53_v1, %v52_v0  ;;  %v54_v4 = vld [vmem:[%s1467_s5 + $0x10] sm:$0xff]  ;;  %v55_v5 = vld [vmem:[%s1467_s5 + $0x18] sm:$0xff]  ;;  %v56_v7 = vld [vmem:[%s1467_s5 + $0x20] sm:$0xff]  ;;  %927 = vset.pattern.permute.xlu0 %v1052_v41  ;;  %928 = vset.pattern.permute.xlu1 %v1052_v41  ;;  %vm1054_vm0 = vmmov 0   ;;  %p513_p0 = scmp.lt.s32.totalorder %s1463_s1, 7 }
   0x3   :  { %v858_v6 = vpack.c.bf16 %v55_v5, %v54_v4  ;;  %v57_v8 = vld [vmem:[%s1467_s5 + $0x28] sm:$0xff]  ;;  %v1126_v10 = vld [vmem:[%s1464_s2] sm:$0xff]  ;;  %v58_v11 = vld [vmem:[%s1467_s5 + $0x30] sm:$0xff]  ;;  %p509_p1 = scmp.gt.s32.totalorder %s1462_s0, 0 }
   0x4   :  { %855 = vmatprep.subr.bf16.mxu0 %v854_v3  ;;  %v862_v9 = vpack.c.bf16 %v57_v8, %v56_v7  ;;  %v59_v12 = vld [vmem:[%s1467_s5 + $0x38] sm:$0xff]  ;;  %795 = vmatprep.mubr.f32.mxu0 %v1126_v10  ;;  %v60_v14 = vld [vmem:[%s1467_s5 + $0x40] sm:$0xff]  ;;  %v61_v15 = vld [vmem:[%s1467_s5 + $0x48] sm:$0xff]  ;;  %s1472_s1 = smov (!%p513_p0, %s1463_s1), 7 }
   0x5   :  { %857 = vmatpush3.bf16.msra.mxu0 %v854_v3  ;;  %v866_v13 = vpack.c.bf16 %v59_v12, %v58_v11  ;;  %v870_v16 = vpack.c.bf16 %v61_v15, %v60_v14  ;;  %v62_v17 = vld [vmem:[%s1467_s5 + $0x50] sm:$0xff]  ;;  %v63_v18 = vld [vmem:[%s1467_s5 + $0x58] sm:$0xff]  ;;  %v64_v20 = vld [vmem:[%s1467_s5 + $0x60] sm:$0xff]  ;;  %s1474_s0 = smov (!%p509_p1, %s1462_s0), 0  ;;  %s515_s9 = sadd.s32 1, %s1472_s1 }
   0x6   :  { %859 = vmatprep.subr.bf16.mxu0 %v858_v6  ;;  %v874_v19 = vpack.c.bf16 %v63_v18, %v62_v17  ;;  %v65_v21 = vld [vmem:[%s1467_s5 + $0x68] sm:$0xff]  ;;  %v66_v23 = vld [vmem:[%s1467_s5 + $0x70] sm:$0xff]  ;;  %v67_v24 = vld [vmem:[%s1467_s5 + $0x78] sm:$0xff]  ;;  %p691_p2 = scmp.ge.s32.totalorder %s1474_s0, %s515_s9 }
   0x7   :  { %v878_v22 = vpack.c.bf16 %v65_v21, %v64_v20  ;;  %v882_v25 = vpack.c.bf16 %v67_v24, %v66_v23  ;;  %v1162_v26 = vld [vmem:[%s1464_s2 + $0x8] sm:$0xff]  ;;  %v1167_v27 = vld [vmem:[%s1464_s2 + $0x10] sm:$0xff]  ;;  %v1174_v28 = vld [vmem:[%s1464_s2 + $0x18] sm:$0xff] }
   0x8   :  { %v1179_v29 = vld [vmem:[%s1464_s2 + $0x20] sm:$0xff]  ;;  %v1186_v30 = vld [vmem:[%s1464_s2 + $0x28] sm:$0xff]  ;;  %v1191_v31 = vld [vmem:[%s1464_s2 + $0x30] sm:$0xff] }
   0x9   :  { %861 = vmatpush3.bf16.msra.mxu0 %v858_v6  ;;  %v1198_v32 = vld [vmem:[%s1464_s2 + $0x38] sm:$0xff]  ;;  %v1203_v33 = vld [vmem:[%s1464_s2 + $0x40] sm:$0xff]  ;;  %v1210_v34 = vld [vmem:[%s1464_s2 + $0x48] sm:$0xff] }
   0xa   :  { %863 = vmatprep.subr.bf16.mxu0 %v862_v9  ;;  %v1215_v35 = vld [vmem:[%s1464_s2 + $0x50] sm:$0xff]  ;;  %v1222_v36 = vld [vmem:[%s1464_s2 + $0x58] sm:$0xff]  ;;  %v1227_v37 = vld [vmem:[%s1464_s2 + $0x60] sm:$0xff] }
   0xb   :  { %v1234_v38 = vld [vmem:[%s1464_s2 + $0x68] sm:$0xff]  ;;  %v1239_v39 = vld [vmem:[%s1464_s2 + $0x70] sm:$0xff]  ;;  %v1246_v40 = vld [vmem:[%s1464_s2 + $0x78] sm:$0xff] }
   0xd   :  { %865 = vmatpush3.bf16.msra.mxu0 %v862_v9 }
   0xe   :  { %867 = vmatprep.subr.bf16.mxu0 %v866_v13 }
  0x11   :  { %869 = vmatpush3.bf16.msra.mxu0 %v866_v13 }
  0x12   :  { %871 = vmatprep.subr.bf16.mxu0 %v870_v16 }
  0x15   :  { %873 = vmatpush3.bf16.msra.mxu0 %v870_v16 }
  0x16   :  { %875 = vmatprep.subr.bf16.mxu0 %v874_v19 }
  0x19   :  { %877 = vmatpush3.bf16.msra.mxu0 %v874_v19 }
  0x1a   :  { %879 = vmatprep.subr.bf16.mxu0 %v878_v22 }
  0x1d   :  { %881 = vmatpush3.bf16.msra.mxu0 %v878_v22 }
  0x1e   :  { %883 = vmatprep.subr.bf16.mxu0 %v882_v25 }
  0x21   :  { %885 = vmatpush3.bf16.msra.mxu0 %v882_v25 }
  0x24   :  { %796 = vmatmul.mubr.f32.vlgmr.msra.gmra.mrb[0].mxu0 %v1162_v26 }
  0x25   :  { %798 = vmatprep.mubr.f32.mxu0 %v1167_v27 }
  0x28   :  { %799 = vmatmul.mubr.f32.gmra.mrb[2].mxu0 %v1174_v28 }
  0x29   :  { %801 = vmatprep.mubr.f32.mxu0 %v1179_v29 }
  0x2c   :  { %802 = vmatmul.mubr.f32.gmra.mrb[4].mxu0 %v1186_v30 }
  0x2d   :  { %804 = vmatprep.mubr.f32.mxu0 %v1191_v31 }
  0x30   :  { %805 = vmatmul.mubr.f32.gmra.mrb[6].mxu0 %v1198_v32 }
  0x31   :  { %807 = vmatprep.mubr.f32.mxu0 %v1203_v33 }
  0x34   :  { %808 = vmatmul.mubr.f32.gmra.mrb[8].mxu0 %v1210_v34 }
  0x35   :  { %810 = vmatprep.mubr.f32.mxu0 %v1215_v35 }
  0x38   :  { %811 = vmatmul.mubr.f32.gmra.mrb[10].mxu0 %v1222_v36 }
  0x39   :  { %813 = vmatprep.mubr.f32.mxu0 %v1227_v37 }
  0x3c   :  { %814 = vmatmul.mubr.f32.gmra.mrb[12].mxu0 %v1234_v38 }
  0x3d   :  { %816 = vmatprep.mubr.f32.mxu0 %v1239_v39 }
  0x40   :  { %817 = vmatmul.mubr.f32.gmra.mrb[14].mxu0 %v1246_v40 }
  0xf7   :  { %v797_v43 = vpop.f32.mrb[0].mxu0 }
  0xf8   :  { %v141_v44 = vadd.f32 %v797_v43, %v1252_v42  ;;  %v135_v45 = vpop.f32.mrb[1].mxu0 }
  0xf9   :  { %v136_v46 = vadd.f32 %v135_v45, %v1252_v42 }
  0xfa   :  { %v696_v47 = vmul.f32 -1.442695, %v141_v44 }
  0xfb   :  { %v695_v48 = vmul.f32 -1.442695, %v136_v46  ;;  %v800_v49 = vpop.f32.mrb[2].mxu0 }
  0xfc   :  { %929 = vpow2.f32 %v696_v47  ;;  %v151_v50 = vadd.f32 %v800_v49, %v1252_v42  ;;  %v145_v51 = vpop.f32.mrb[3].mxu0 }
  0xfd   :  { %931 = vpow2.f32 %v695_v48  ;;  %v146_v52 = vadd.f32 %v145_v51, %v1252_v42 }
  0xfe   :  { %v698_v53 = vmul.f32 -1.442695, %v151_v50 }
  0xff   :  { %v697_v54 = vmul.f32 -1.442695, %v146_v52  ;;  %v803_v55 = vpop.f32.mrb[4].mxu0 }
 0x100   :  { %933 = vpow2.f32 %v698_v53  ;;  %v161_v56 = vadd.f32 %v803_v55, %v1252_v42  ;;  %v155_v57 = vpop.f32.mrb[5].mxu0 }
 0x101   :  { %935 = vpow2.f32 %v697_v54  ;;  %v156_v58 = vadd.f32 %v155_v57, %v1252_v42 }
 0x102   :  { %v700_v59 = vmul.f32 -1.442695, %v161_v56 }
 0x103   :  { %v699_v60 = vmul.f32 -1.442695, %v156_v58  ;;  %v806_v61 = vpop.f32.mrb[6].mxu0 }
 0x104   :  { %937 = vpow2.f32 %v700_v59  ;;  %v171_v62 = vadd.f32 %v806_v61, %v1252_v42  ;;  %v165_v63 = vpop.f32.mrb[7].mxu0 }
 0x105   :  { %939 = vpow2.f32 %v699_v60  ;;  %v166_v0 = vadd.f32 %v165_v63, %v1252_v42 }
 0x106   :  { %v930_v1 = vpop.eup %929  ;;  %v702_v2 = vmul.f32 -1.442695, %v171_v62 }
 0x107   :  { %v932_v3 = vpop.eup %931  ;;  %v263_v4 = vadd.f32 1.0, %v930_v1  ;;  %v701_v5 = vmul.f32 -1.442695, %v166_v0  ;;  %v809_v6 = vpop.f32.mrb[8].mxu0 }
 0x108   :  { %v262_v7 = vadd.f32 1.0, %v932_v3  ;;  %941 = vpow2.f32 %v702_v2  ;;  %v181_v8 = vadd.f32 %v809_v6, %v1252_v42  ;;  %v175_v9 = vpop.f32.mrb[9].mxu0 }
 0x109   :  { %943 = vrcp.f32 %v263_v4  ;;  %v176_v11 = vadd.f32 %v175_v9, %v1252_v42 }
 0x10a   :  { %v934_v12 = vpop.eup %933  ;;  %945 = vrcp.f32 %v262_v7  ;;  %v704_v13 = vmul.f32 -1.442695, %v181_v8 }
 0x10b   :  { %v936_v14 = vpop.eup %935  ;;  %v265_v15 = vadd.f32 1.0, %v934_v12  ;;  %947 = vpow2.f32 %v701_v5  ;;  %v703_v16 = vmul.f32 -1.442695, %v176_v11  ;;  %v812_v17 = vpop.f32.mrb[10].mxu0  ;;  %v1053_v11 = vmov 0.0|0.0  }
 0x10c   :  { %v264_v18 = vadd.f32 1.0, %v936_v14  ;;  %949 = vpow2.f32 %v704_v13  ;;  %v191_v19 = vadd.f32 %v812_v17, %v1252_v42  ;;  %v185_v20 = vpop.f32.mrb[11].mxu0  ;;  %886 = vmatprep.subr.bf16.mxu1 %v1053_v11 }
 0x10d   :  { %951 = vrcp.f32 %v265_v15  ;;  %v186_v21 = vadd.f32 %v185_v20, %v1252_v42 }
 0x10e   :  { %v938_v22 = vpop.eup %937  ;;  %953 = vrcp.f32 %v264_v18  ;;  %v706_v23 = vmul.f32 -1.442695, %v191_v19 }
 0x10f   :  { %v940_v24 = vpop.eup %939  ;;  %v267_v25 = vadd.f32 1.0, %v938_v22  ;;  %955 = vpow2.f32 %v703_v16  ;;  %v705_v41 = vmul.f32 -1.442695, %v186_v21  ;;  %v815_v43 = vpop.f32.mrb[12].mxu0 }
 0x110   :  { %v266_v44 = vadd.f32 1.0, %v940_v24  ;;  %957 = vpow2.f32 %v706_v23  ;;  %v201_v45 = vadd.f32 %v815_v43, %v1252_v42  ;;  %v195_v46 = vpop.f32.mrb[13].mxu0 }
 0x111   :  { %959 = vrcp.f32 %v267_v25  ;;  %v196_v47 = vadd.f32 %v195_v46, %v1252_v42 }
 0x112   :  { %v942_v48 = vpop.eup %941  ;;  %961 = vrcp.f32 %v266_v44  ;;  %v708_v49 = vmul.f32 -1.442695, %v201_v45  ;;  %v1055_v45 = vmov 0.0  }
 0x113   :  { %v944_v50 = vpop.eup %943  ;;  %v269_v51 = vadd.f32 1.0, %v942_v48  ;;  %963 = vpow2.f32 %v705_v41  ;;  %v707_v52 = vmul.f32 -1.442695, %v196_v47  ;;  %v818_v53 = vpop.f32.mrb[14].mxu0  ;;  %851 = vmatprep.mubr.msk.f32.mxu1 %vm1054_vm0, %v1055_v45  ;;  %v1321_v45 = vld [vmem:[%s1466_s4 + $0x18] sm:$0xff] }
 0x114   :  { %v946_v54 = vpop.eup %945  ;;  %965 = vpow2.f32 %v708_v49  ;;  %v211_v55 = vadd.f32 %v818_v53, %v1252_v42  ;;  %v205_v56 = vpop.f32.mrb[15].mxu0 }
 0x115   :  { %v948_v57 = vpop.eup %947  ;;  %v206_v58 = vadd.f32 %v205_v56, %v1252_v42  ;;  %312 = vperm.xlu0 %927, %v946_v54   ;;  %967 = vpow2.f32 %v707_v52 }
 0x116   :  { %v950_v59 = vpop.eup %949  ;;  %v268_v60 = vadd.f32 1.0, %v948_v57  ;;  %v710_v61 = vmul.f32 -1.442695, %v211_v55  ;;  %969 = vrcp.f32 %v269_v51 }
 0x117   :  { %v952_v62 = vpop.eup %951  ;;  %v271_v63 = vadd.f32 1.0, %v950_v59  ;;  %v709_v0 = vmul.f32 -1.442695, %v206_v58 }
 0x118   :  { %v954_v1 = vpop.eup %953  ;;  %971 = vrcp.f32 %v268_v60  ;;  %327 = vperm.xlu1 %928, %v952_v62  }
 0x119   :  { %v956_v2 = vpop.eup %955  ;;  %973 = vrcp.f32 %v271_v63  ;;  %317 = vperm.xlu0 %927, %v944_v50  }
 0x11a   :  { %v958_v3 = vpop.eup %957  ;;  %v270_v4 = vadd.f32 1.0, %v956_v2  ;;  %975 = vpow2.f32 %v710_v61 }
 0x11b   :  { %v960_v5 = vpop.eup %959  ;;  %v273_v42 = vadd.f32 1.0, %v958_v3  ;;  %977 = vpow2.f32 %v709_v0 }
 0x11c   :  { %v962_v6 = vpop.eup %961  ;;  %979 = vrcp.f32 %v270_v4  ;;  %322 = vperm.xlu1 %928, %v954_v1  }
 0x11d   :  { %v964_v7 = vpop.eup %963  ;;  %332 = vperm.xlu0 %927, %v962_v6   ;;  %981 = vrcp.f32 %v273_v42 }
 0x11e   :  { %v966_v8 = vpop.eup %965  ;;  %v272_v9 = vadd.f32 1.0, %v964_v7 }
 0x11f   :  { %v275_v12 = vadd.f32 1.0, %v966_v8  ;;  %v968_v13 = vpop.eup %967 }
 0x120   :  { %983 = vrcp.f32 %v272_v9  ;;  %337 = vperm.xlu1 %928, %v960_v5   ;;  %v970_v14 = vpop.eup %969  ;;  %v274_v15 = vadd.f32 1.0, %v968_v13 }
 0x121   :  { %985 = vrcp.f32 %v275_v12 }
 0x122   :  { %v972_v16 = vpop.eup %971  ;;  %987 = vrcp.f32 %v274_v15 }
 0x123   :  { %v974_v17 = vpop.eup %973  ;;  %342 = vperm.xlu0 %927, %v972_v16  }
 0x124   :  { %v976_v18 = vpop.eup %975  ;;  %347 = vperm.xlu1 %928, %v970_v14  }
 0x125   :  { %v978_v19 = vpop.eup %977  ;;  %v277_v20 = vadd.f32 1.0, %v976_v18 }
 0x126   :  { %v980_v21 = vpop.eup %979  ;;  %v276_v22 = vadd.f32 1.0, %v978_v19 }
 0x127   :  { %989 = vrcp.f32 %v277_v20  ;;  %352 = vperm.xlu0 %927, %v980_v21   ;;  %v982_v23 = vpop.eup %981 }
 0x128   :  { %991 = vrcp.f32 %v276_v22  ;;  %357 = vperm.xlu1 %928, %v974_v17   ;;  %v407_v17 = vlaneseq }
 0x12a   :  { %v984_v24 = vpop.eup %983 }
 0x12b   :  { %362 = vperm.xlu0 %927, %v984_v24   ;;  %v986_v25 = vpop.eup %985 }
 0x12c   :  { %367 = vperm.xlu1 %928, %v982_v23   ;;  %v988_v41 = vpop.eup %987  ;;  %v408_v23 = vshrl.u32 %v407_v17, 7 }
 0x12f   :  { %372 = vperm.xlu0 %927, %v988_v41   ;;  %v1056_v41 = vmov 1.0  }
 0x130   :  { %377 = vperm.xlu1 %928, %v986_v25   ;;  %v711_v25 = vld [vmem:[%s1465_s3] ss:$0 sm:$0xff] }
 0x131   :  { %v990_v43 = vpop.eup %989  ;;  %vm416_vm1 = vcmp.eq.s32.totalorder %v408_v23, %v711_v25 }
 0x132   :  { %v992_v44 = vpop.eup %991 }
 0x133   :  { %382 = vperm.xlu0 %927, %v992_v44   ;;  %v1313_v44 = vld [vmem:[%s1466_s4 + $0x10] sm:$0xff] }
 0x134   :  { %387 = vperm.xlu1 %928, %v990_v43   ;;  %v1303_v43 = vld [vmem:[%s1466_s4] sm:$0xff] }
 0x194   :  { %v313_v46 = vpop.permute.xlu0 %312 }
 0x195   :  { %v390_v49 = vmul.f32 %v313_v46, %v1126_v10  ;;  %v1326_v46 = vld [vmem:[%s1466_s4 + $0x20] sm:$0xff] }
 0x197   :  { %v328_v47 = vpop.permute.xlu1 %327 }
 0x198   :  { %v318_v48 = vpop.permute.xlu0 %317  ;;  %v393_v53 = vmul.f32 %v328_v47, %v1174_v28  ;;  %v1331_v47 = vld [vmem:[%s1466_s4 + $0x28] sm:$0xff] }
 0x199   :  { %v391_v50 = vmul.f32 %v318_v48, %v1162_v26  ;;  %v1341_v48 = vld [vmem:[%s1466_s4 + $0x30] sm:$0xff] }
 0x19b   :  { %v323_v51 = vpop.permute.xlu1 %322  ;;  %v887_v52 = vpack.c.bf16 %v391_v50, %v390_v49  ;;  %v1346_v49 = vld [vmem:[%s1466_s4 + $0x38] sm:$0xff]  ;;  %v1351_v50 = vld [vmem:[%s1466_s4 + $0x40] sm:$0xff] }
 0x19c   :  { %v392_v54 = vmul.f32 %v323_v51, %v1167_v27  ;;  %v333_v55 = vpop.permute.xlu0 %332  ;;  %v1359_v51 = vld [vmem:[%s1466_s4 + $0x48] sm:$0xff] }
 0x19d   :  { %888 = vmatpush3.bf16.msra.mxu1 %v887_v52  ;;  %v394_v58 = vmul.f32 %v333_v55, %v1179_v29  ;;  %v1364_v52 = vld [vmem:[%s1466_s4 + $0x50] sm:$0xff]  ;;  %v1380_v55 = vld [vmem:[%s1466_s4 + $0x68] sm:$0xff] }
 0x19e   :  { %v890_v56 = vpack.c.bf16 %v393_v53, %v392_v54  ;;  %889 = vmatprep.subr.bf16.mxu1 %v1053_v11  ;;  %v1369_v53 = vld [vmem:[%s1466_s4 + $0x58] sm:$0xff]  ;;  %v1375_v54 = vld [vmem:[%s1466_s4 + $0x60] sm:$0xff] }
 0x19f   :  { %v338_v57 = vpop.permute.xlu1 %337 }
 0x1a0   :  { %v395_v59 = vmul.f32 %v338_v57, %v1186_v30  ;;  %v1390_v57 = vld [vmem:[%s1466_s4 + $0x78] sm:$0xff] }
 0x1a1   :  { %891 = vmatpush3.bf16.msra.mxu1 %v890_v56  ;;  %v1385_v56 = vld [vmem:[%s1466_s4 + $0x70] sm:$0xff] }
 0x1a2   :  { %v893_v60 = vpack.c.bf16 %v395_v59, %v394_v58  ;;  %v343_v61 = vpop.permute.xlu0 %342  ;;  %892 = vmatprep.subr.bf16.mxu1 %v1053_v11 }
 0x1a3   :  { %v348_v62 = vpop.permute.xlu1 %347  ;;  %v396_v63 = vmul.f32 %v343_v61, %v1191_v31 }
 0x1a4   :  { %v397_v0 = vmul.f32 %v348_v62, %v1198_v32 }
 0x1a5   :  { %894 = vmatpush3.bf16.msra.mxu1 %v893_v60 }
 0x1a6   :  { %v896_v1 = vpack.c.bf16 %v397_v0, %v396_v63  ;;  %v353_v2 = vpop.permute.xlu0 %352  ;;  %895 = vmatprep.subr.bf16.mxu1 %v1053_v11 }
 0x1a7   :  { %v358_v3 = vpop.permute.xlu1 %357  ;;  %v398_v4 = vmul.f32 %v353_v2, %v1203_v33 }
 0x1a8   :  { %v399_v5 = vmul.f32 %v358_v3, %v1210_v34 }
 0x1a9   :  { %897 = vmatpush3.bf16.msra.mxu1 %v896_v1 }
 0x1aa   :  { %v899_v42 = vpack.c.bf16 %v399_v5, %v398_v4  ;;  %v363_v6 = vpop.permute.xlu0 %362  ;;  %898 = vmatprep.subr.bf16.mxu1 %v1053_v11 }
 0x1ab   :  { %v368_v7 = vpop.permute.xlu1 %367  ;;  %v400_v8 = vmul.f32 %v363_v6, %v1215_v35 }
 0x1ac   :  { %v401_v9 = vmul.f32 %v368_v7, %v1222_v36 }
 0x1ad   :  { %900 = vmatpush3.bf16.msra.mxu1 %v899_v42 }
 0x1ae   :  { %v902_v12 = vpack.c.bf16 %v401_v9, %v400_v8  ;;  %v373_v13 = vpop.permute.xlu0 %372  ;;  %901 = vmatprep.subr.bf16.mxu1 %v1053_v11 }
 0x1af   :  { %v378_v14 = vpop.permute.xlu1 %377  ;;  %v402_v15 = vmul.f32 %v373_v13, %v1227_v37 }
 0x1b0   :  { %v403_v16 = vmul.f32 %v378_v14, %v1234_v38 }
 0x1b1   :  { %903 = vmatpush3.bf16.msra.mxu1 %v902_v12 }
 0x1b2   :  { %v905_v18 = vpack.c.bf16 %v403_v16, %v402_v15  ;;  %v383_v19 = vpop.permute.xlu0 %382  ;;  %904 = vmatprep.subr.bf16.mxu1 %v1053_v11 }
 0x1b3   :  { %v388_v20 = vpop.permute.xlu1 %387  ;;  %v404_v21 = vmul.f32 %v383_v19, %v1239_v39 }
 0x1b4   :  { %v405_v22 = vmul.f32 %v388_v20, %v1246_v40 }
 0x1b5   :  { %906 = vmatpush3.bf16.msra.mxu1 %v905_v18 }
 0x1b6   :  { %v908_v24 = vpack.c.bf16 %v405_v22, %v404_v21  ;;  %907 = vmatprep.subr.bf16.mxu1 %v1053_v11  ;;  %v1308_v11 = vld [vmem:[%s1466_s4 + $0x8] sm:$0xff] }
 0x1b9   :  { %909 = vmatpush3.bf16.msra.mxu1 %v908_v24 }
 0x1bc   :  { %852 = vmatmul.mubr.msk.f32.vlgmr.msra.gmra.mrb[0].mxu1 %vm416_vm1, %v1056_v41 }
 0x28a   :  { %692 = sbr.rel (%p691_p2) target bundleno = 839 (0x347), region = 54 }
 0x28f   :  { %v486_v58 = vpop.f32.mrb[0].mxu1 }
 0x290   :  { %v853_v59 = vpop.f32.mrb[1].mxu1  ;;  %491 = vst [vmem:[#allocation6] sm:$0xff] %v486_v58 }
 0x291 LB: > { %v1057_v60 = vmov 0   ;;  %v522_v61 = vstv %s1049_s0  ;;  %s657_s4 = scalar_lea.vmem [#allocation8], %s1049_s0  ;;  %s519_s0 = sadd.s32 1, %s1049_s0   ;;  %s1049_s0 = sphi %s1474_s0, %s519_s0  }
 0x292   : > { %994 = vset.pattern.permute.xlu1 %v1057_v60  ;;  %993 = vset.pattern.permute.xlu0 %v1057_v60  ;;  %vm525_vm2 = vcmp.eq.s32.totalorder %v1313_v44, %v522_v61  ;;  %vm523_vm3 = vcmp.eq.s32.totalorder %v1303_v43, %v522_v61  ;;  %vm526_vm4 = vcmp.eq.s32.totalorder %v1321_v45, %v522_v61  ;;  %p518_p3 = scmp.ge.s32.totalorder %s519_s0, %s515_s9 }
 0x293   : > { %vm524_vm5 = vcmp.eq.s32.totalorder %v1308_v11, %v522_v61  ;;  %v541_v62 = vsel %vm525_vm2, 1, %v1057_v60  ;;  %v539_v63 = vsel %vm523_vm3, 1, %v1057_v60  ;;  %v542_v0 = vsel %vm526_vm4, 1, %v1057_v60 }
 0x294   : > { %562 = vperm.xlu1 %994, %v541_v62   ;;  %556 = vperm.xlu0 %993, %v539_v63   ;;  %v540_v1 = vsel %vm524_vm5, 1, %v1057_v60  ;;  %vm528_vm6 = vcmp.eq.s32.totalorder %v1331_v47, %v522_v61  ;;  %vm527_vm7 = vcmp.eq.s32.totalorder %v1326_v46, %v522_v61  ;;  %vm530_vm8 = vcmp.eq.s32.totalorder %v1346_v49, %v522_v61 }
 0x295   : > { %v544_v2 = vsel %vm528_vm6, 1, %v1057_v60  ;;  %v543_v3 = vsel %vm527_vm7, 1, %v1057_v60  ;;  %vm529_vm9 = vcmp.eq.s32.totalorder %v1341_v48, %v522_v61  ;;  %v546_v4 = vsel %vm530_vm8, 1, %v1057_v60 }
 0x296   : > { %v545_v5 = vsel %vm529_vm9, 1, %v1057_v60  ;;  %vm532_vm10 = vcmp.eq.s32.totalorder %v1359_v51, %v522_v61  ;;  %vm531_vm11 = vcmp.eq.s32.totalorder %v1351_v50, %v522_v61  ;;  %vm534_vm12 = vcmp.eq.s32.totalorder %v1369_v53, %v522_v61 }
 0x297   : > { %v548_v42 = vsel %vm532_vm10, 1, %v1057_v60  ;;  %v547_v6 = vsel %vm531_vm11, 1, %v1057_v60  ;;  %vm533_vm13 = vcmp.eq.s32.totalorder %v1364_v52, %v522_v61  ;;  %v550_v7 = vsel %vm534_vm12, 1, %v1057_v60 }
 0x298   : > { %565 = vperm.xlu1 %994, %v542_v0   ;;  %559 = vperm.xlu0 %993, %v540_v1   ;;  %v549_v8 = vsel %vm533_vm13, 1, %v1057_v60  ;;  %vm536_vm14 = vcmp.eq.s32.totalorder %v1380_v55, %v522_v61  ;;  %vm535_vm15 = vcmp.eq.s32.totalorder %v1375_v54, %v522_v61  ;;  %vm538_vm0 = vcmp.eq.s32.totalorder %v1390_v57, %v522_v61 }
 0x299   : > { %v552_v9 = vsel %vm536_vm14, 1, %v1057_v60  ;;  %v551_v12 = vsel %vm535_vm15, 1, %v1057_v60  ;;  %vm537_vm1 = vcmp.eq.s32.totalorder %v1385_v56, %v522_v61  ;;  %v554_v13 = vsel %vm538_vm0, 1, %v1057_v60 }
 0x29a   : > { %v553_v14 = vsel %vm537_vm1, 1, %v1057_v60 }
 0x29c   : > { %571 = vperm.xlu1 %994, %v544_v2   ;;  %568 = vperm.xlu0 %993, %v543_v3  }
 0x2a0   : > { %577 = vperm.xlu1 %994, %v546_v4   ;;  %574 = vperm.xlu0 %993, %v545_v5  }
 0x2a4   : > { %583 = vperm.xlu1 %994, %v548_v42   ;;  %580 = vperm.xlu0 %993, %v547_v6  }
 0x2a8   : > { %589 = vperm.xlu1 %994, %v550_v7   ;;  %586 = vperm.xlu0 %993, %v549_v8  }
 0x2ac   : > { %595 = vperm.xlu1 %994, %v552_v9   ;;  %592 = vperm.xlu0 %993, %v551_v12  }
 0x2b0   : > { %601 = vperm.xlu1 %994, %v554_v13   ;;  %598 = vperm.xlu0 %993, %v553_v14  }
 0x313   : > { %v563_v15 = vpop.permute.xlu1 %562  ;;  %v557_v16 = vpop.permute.xlu0 %556 }
 0x314   : > { %vm605_vm4 = vcmp.eq.s32.totalorder %v563_v15, 1  ;;  %vm603_vm5 = vcmp.eq.s32.totalorder %v557_v16, 1 }
 0x315   : > { %v621_v60 = vsel %vm605_vm4, %v1167_v27, -inf  ;;  %v619_v61 = vsel %vm603_vm5, %v1126_v10, -inf }
 0x317   : > { %v566_v17 = vpop.permute.xlu1 %565  ;;  %v560_v18 = vpop.permute.xlu0 %559 }
 0x318   : > { %vm606_vm6 = vcmp.eq.s32.totalorder %v566_v17, 1  ;;  %vm604_vm7 = vcmp.eq.s32.totalorder %v560_v18, 1 }
 0x319   : > { %v622_v62 = vsel %vm606_vm6, %v1174_v28, -inf  ;;  %v620_v63 = vsel %vm604_vm7, %v1162_v26, -inf }
 0x31b   : > { %v572_v19 = vpop.permute.xlu1 %571  ;;  %v569_v20 = vpop.permute.xlu0 %568 }
 0x31c   : > { %vm608_vm2 = vcmp.eq.s32.totalorder %v572_v19, 1  ;;  %vm607_vm3 = vcmp.eq.s32.totalorder %v569_v20, 1 }
 0x31d   : > { %v624_v58 = vsel %vm608_vm2, %v1186_v30, -inf  ;;  %v623_v59 = vsel %vm607_vm3, %v1179_v29, -inf }
 0x31e   : > { %v636_v2 = vmax.f32 %v620_v63, %v624_v58  ;;  %v635_v3 = vmax.f32 %v619_v61, %v623_v59 }
 0x31f   : > { %v578_v21 = vpop.permute.xlu1 %577  ;;  %v575_v22 = vpop.permute.xlu0 %574 }
 0x320   : > { %vm610_vm8 = vcmp.eq.s32.totalorder %v578_v21, 1  ;;  %vm609_vm9 = vcmp.eq.s32.totalorder %v575_v22, 1 }
 0x321   : > { %v626_v0 = vsel %vm610_vm8, %v1198_v32, -inf  ;;  %v625_v1 = vsel %vm609_vm9, %v1191_v31, -inf }
 0x322   : > { %v638_v9 = vmax.f32 %v622_v62, %v626_v0  ;;  %v637_v12 = vmax.f32 %v621_v60, %v625_v1 }
 0x323   : > { %v584_v23 = vpop.permute.xlu1 %583  ;;  %v581_v24 = vpop.permute.xlu0 %580 }
 0x324   : > { %vm612_vm10 = vcmp.eq.s32.totalorder %v584_v23, 1  ;;  %vm611_vm11 = vcmp.eq.s32.totalorder %v581_v24, 1 }
 0x325   : > { %v628_v4 = vsel %vm612_vm10, %v1210_v34, -inf  ;;  %v627_v5 = vsel %vm611_vm11, %v1203_v33, -inf }
 0x326   : > { %v640_v15 = vmax.f32 %v636_v2, %v628_v4  ;;  %v639_v16 = vmax.f32 %v635_v3, %v627_v5  ;;  %v658_v2 = vld [vmem:[%s657_s4] sm:$0x1] }
 0x327   : > { %v590_v25 = vpop.permute.xlu1 %589  ;;  %v587_v41 = vpop.permute.xlu0 %586 }
 0x328   : > { %vm614_vm12 = vcmp.eq.s32.totalorder %v590_v25, 1  ;;  %vm613_vm13 = vcmp.eq.s32.totalorder %v587_v41, 1 }
 0x329   : > { %v630_v7 = vsel %vm614_vm12, %v1222_v36, -inf  ;;  %v629_v8 = vsel %vm613_vm13, %v1215_v35, -inf }
 0x32a   : > { %v642_v17 = vmax.f32 %v638_v9, %v630_v7  ;;  %v641_v18 = vmax.f32 %v637_v12, %v629_v8 }
 0x32b   : > { %v596_v42 = vpop.permute.xlu1 %595  ;;  %v593_v6 = vpop.permute.xlu0 %592 }
 0x32c   : > { %vm616_vm14 = vcmp.eq.s32.totalorder %v596_v42, 1  ;;  %vm615_vm15 = vcmp.eq.s32.totalorder %v593_v6, 1 }
 0x32d   : > { %v632_v13 = vsel %vm616_vm14, %v1234_v38, -inf  ;;  %v631_v14 = vsel %vm615_vm15, %v1227_v37, -inf }
 0x32e   : > { %v644_v21 = vmax.f32 %v640_v15, %v632_v13  ;;  %v643_v22 = vmax.f32 %v639_v16, %v631_v14 }
 0x32f   : > { %v602_v19 = vpop.permute.xlu1 %601  ;;  %v599_v20 = vpop.permute.xlu0 %598 }
 0x330   : > { %vm618_vm0 = vcmp.eq.s32.totalorder %v602_v19, 1  ;;  %vm617_vm1 = vcmp.eq.s32.totalorder %v599_v20, 1  ;;  %v647_v58 = vmax.f32 %v643_v22, %v644_v21 }
 0x331   : > { %v634_v23 = vsel %vm618_vm0, %v1246_v40, -inf  ;;  %v633_v24 = vsel %vm617_vm1, %v1239_v39, -inf }
 0x332   : > { %v646_v25 = vmax.f32 %v642_v17, %v634_v23  ;;  %v645_v41 = vmax.f32 %v641_v18, %v633_v24 }
 0x334   : > { %v648_v59 = vmax.f32 %v645_v41, %v646_v25 }
 0x336   : > { %v649_v60 = vmax.f32 %v647_v58, %v648_v59 }
 0x338   : > { %v650_v61 = vrot.slane %v649_v60, 4 }
 0x33a   : > { %v651_v62 = vmax.f32 %v649_v60, %v650_v61 }
 0x33c   : > { %v652_v63 = vrot.slane %v651_v62, 2 }
 0x33e   : > { %v653_v0 = vmax.f32 %v651_v62, %v652_v63 }
 0x340   : > { %v654_v1 = vrot.slane %v653_v0, 1  ;;  %521 = sbr.rel (!%p518_p3) target bundleno = 657 (0x291), region = 60 }
 0x342   : > { %v655_v3 = vmax.f32 %v653_v0, %v654_v1 }
 0x344   : > { %v659_v4 = vmax.f32 %v658_v2, %v655_v3 }
 0x346   : > { %660 = vst [vmem:[%s657_s4] sm:$0x1] %v659_v4 }
 0x347 PF:  { %s1058_s17 = smov [#allocation6]   ;;  %s1059_s19 = smov [#allocation8]  }
 0x348   :  { %s667_s18 = sshll.u32 %s1058_s17, 4  ;;  %s677_s20 = sshll.u32 %s1059_s19, 4  ;;  %s668_s18 = int_to_ptr.vmem [resolvable:$true] %s667_s18  ;;  %s678_s20 = int_to_ptr.vmem [resolvable:$true] %s677_s20 }
 0x349   :  { %s995_s5 = scalar_lea.vmem %s668_s18, 128  ;;  %p1000_p5 = scmp.lt.s32.totalorder %s668_s18, %s668_s18 }
 0x34a   :  { %p996_p4 = scmp.ne.s32.totalorder %s668_s18, %s995_s5  ;;  %p1001_p6 = scmp.lt.s32.totalorder %s995_s5, %s995_s5 }
 0x34c   :  { %p1002_p7 = por %p1001_p6, %p1000_p5 }
 0x34e   :  { %p1003_p8 = pnand %p1002_p7, %p996_p4 }
 0x350   :  { %1006 = shalt.err (!%p1003_p8)
}
 0x351   :  { %s1007_s23 = scalar_lea.hbm %s1469_s7, 128 }
 0x352   :  { %p1008_p9 = scmp.ne.s32.totalorder %s1469_s7, %s1007_s23  ;;  %p1011_p10 = scmp.lt.u32.totalorder %s1007_s23, %s1469_s7 }
 0x354   :  { %p1013_p11 = pnand %p1011_p10, %p1008_p9 }
 0x356   :  { %1016 = shalt.err (!%p1013_p11)
}
 0x357   :  { %670 = dma.vmem_to_hbm [thread:$0]  %s668_s18, 128, %s1469_s7, [#allocation7]  }
 0x358   :  { %s1017_s26 = scalar_lea.vmem %s678_s20, 128  ;;  %p1022_p13 = scmp.lt.s32.totalorder %s678_s20, %s678_s20 }
 0x359   :  { %p1018_p12 = scmp.ne.s32.totalorder %s678_s20, %s1017_s26  ;;  %p1023_p0 = scmp.lt.s32.totalorder %s1017_s26, %s1017_s26 }
 0x35b   :  { %p1024_p1 = por %p1023_p0, %p1022_p13 }
 0x35d   :  { %p1025_p2 = pnand %p1024_p1, %p1018_p12 }
 0x35f   :  { %1028 = shalt.err (!%p1025_p2)
}
 0x360   :  { %s1029_s29 = scalar_lea.hbm %s1470_s8, 128 }
 0x361   :  { %p1030_p3 = scmp.ne.s32.totalorder %s1470_s8, %s1029_s29  ;;  %p1033_p4 = scmp.lt.u32.totalorder %s1029_s29, %s1470_s8 }
 0x363   :  { %p1035_p5 = pnand %p1033_p4, %p1030_p3 }
 0x365   :  { %1038 = shalt.err (!%p1035_p5)
}
 0x366   :  { %680 = dma.vmem_to_hbm [thread:$0]  %s678_s20, 128, %s1470_s8, [#allocation9]  }
 0x367   :  { %1043 = dma.done.wait [#allocation7], 128  }
 0x368   :  { %1044 = vsyncadd [#allocation7], 4294967168 }
 0x369   :  { %1045 = dma.done.wait [#allocation9], 128  }
 0x36a   :  { %1046 = vsyncadd [#allocation9], 4294967168 }
 0x36b   :  { %687 = vsyncpa [#allocation7], 1 }
 0x36c   :  { %688 = vsyncpa [#allocation9], 1 }

</bundles_post_ra>
